<compile_context>
chip_gen: v7x
topology: tpu7x:2x2x1
jax: 0.10.0
libtpu: 0.0.40
codegen_flags: <defaults>
</compile_context>

<pallas_src>
import functools

import jax
import jax.numpy as jnp
from jax.experimental import pallas as pl
from jax.experimental.pallas import tpu as pltpu


def _round_up(x: int, m: int) -> int:
    return ((x + m - 1) // m) * m


def _encoder_kernel(x_ref, w1_ref, b1_ref, g_ref, be_ref, wp_ref, bp_ref,
                    o_ref, acc_ref, *, num_patches, embed_dim):
    """One grid step: a (TB images) x (TP patches) tile.

    x_ref : [TB, TP, Kp]  bf16 patch pixels
    w1_ref: [Kp, Dp] bf16   b1/g/be: [1, Dp] f32
    wp_ref: [Dp, Fp] bf16   bp     : [1, Fp] f32
    o_ref : [TB, Fp] f32 features
    acc_ref: [TB, Dp] f32 per-image pooled-sum accumulator (scratch)
    """
    pi = pl.program_id(1)

    @pl.when(pi == 0)
    def _init():
        acc_ref[...] = jnp.zeros_like(acc_ref)

    tb, tp, kp = x_ref.shape
    dp = w1_ref.shape[1]

    # Patch embedding on the MXU: bf16 operands, f32 accumulation.
    x2 = x_ref[...].reshape(tb * tp, kp)
    h = jnp.dot(x2, w1_ref[...], preferred_element_type=jnp.float32)  # [TB*TP, Dp]
    h = h + b1_ref[...]

    # LayerNorm over the *real* embed dim (Dp may be zero-padded past it).
    d_idx = jax.lax.broadcasted_iota(jnp.int32, (1, dp), 1)
    dmask = (d_idx < embed_dim).astype(jnp.float32)
    inv_d = 1.0 / float(embed_dim)
    mu = jnp.sum(h * dmask, axis=-1, keepdims=True) * inv_d
    diff = (h - mu) * dmask
    var = jnp.sum(diff * diff, axis=-1, keepdims=True) * inv_d
    hn = diff * jax.lax.rsqrt(var + 1e-5)
    hn = hn * g_ref[...] + be_ref[...]            # zero-padded gamma/beta -> padded cols stay 0

    # Accumulate per-image patch sums; mask out padded patch rows.
    p_idx = pi * tp + jax.lax.broadcasted_iota(jnp.int32, (1, tp, 1), 1)
    pmask = (p_idx < num_patches).astype(jnp.float32)
    hn3 = hn.reshape(tb, tp, dp) * pmask
    acc_ref[...] += jnp.sum(hn3, axis=1)          # [TB, Dp]

    # Finalize on the last patch block: mean over patches + projection.
    @pl.when(pi == pl.num_programs(1) - 1)
    def _finalize():
        pooled = acc_ref[...] * (1.0 / float(num_patches))        # [TB, Dp] f32
        feats = jnp.dot(pooled.astype(wp_ref.dtype), wp_ref[...],
                        preferred_element_type=jnp.float32) + bp_ref[...]
        o_ref[...] = feats.astype(o_ref.dtype)


def init_params(key, in_channels, patch, embed_dim, feat_dim):
    k1, k2, k3 = jax.random.split(key, 3)
    kdim = in_channels * patch * patch
    w1 = jax.random.normal(k1, (kdim, embed_dim), jnp.float32) * 0.02
    b1 = jnp.zeros((1, embed_dim), jnp.float32)
    gamma = jnp.ones((1, embed_dim), jnp.float32)
    beta = jnp.zeros((1, embed_dim), jnp.float32)
    wp = jax.random.normal(k2, (embed_dim, feat_dim), jnp.float32) * 0.02
    bp = jax.random.normal(k3, (1, feat_dim), jnp.float32) * 0.01
    return dict(w1=w1, b1=b1, gamma=gamma, beta=beta, wp=wp, bp=bp)


def _pad2(a, rows, cols):
    return jnp.pad(a, ((0, rows - a.shape[0]), (0, cols - a.shape[1])))


def model_wrapper_forward(images, params, *, patch=8):
    """Equivalent of ModelWrapper.forward: images (NCHW) -> features [B, F]."""
    B, C, H, W = images.shape
    assert H % patch == 0 and W % patch == 0
    P = (H // patch) * (W // patch)
    K = C * patch * patch
    D = params["w1"].shape[1]
    F = params["wp"].shape[1]

    # Lane-aligned padded sizes (multiples of 128 on the last axis).
    Kp, Dp, Fp = _round_up(K, 128), _round_up(D, 128), _round_up(F, 128)

    # Row tiling: TB images x TP patches per grid step (sublane-aligned).
    TB = min(_round_up(B, 8), 16)
    Bp = _round_up(B, TB)
    TP = min(_round_up(P, 8), 64)
    Pp = _round_up(P, TP)

    # Patchify NCHW -> [B, P, C*patch*patch] (matches a PyTorch
    # Conv2d(kernel=stride=patch) unfold ordering).
    # TODO(synk): fold this gather into the kernel with a per-patch index_map /
    # strided DMA to avoid the extra HBM pass over the image tensor.
    x = images.reshape(B, C, H // patch, patch, W // patch, patch)
    x = x.transpose(0, 2, 4, 1, 3, 5).reshape(B, P, K)
    x = jnp.pad(x, ((0, Bp - B), (0, Pp - P), (0, Kp - K))).astype(jnp.bfloat16)

    # Zero-padded weights: bf16 MXU operands, f32 bias/LayerNorm params.
    w1 = _pad2(params["w1"], Kp, Dp).astype(jnp.bfloat16)
    wp = _pad2(params["wp"], Dp, Fp).astype(jnp.bfloat16)
    b1 = _pad2(params["b1"], 1, Dp)
    gamma = _pad2(params["gamma"], 1, Dp)     # zero-padded -> padded cols emit 0
    beta = _pad2(params["beta"], 1, Dp)
    bp = _pad2(params["bp"], 1, Fp)

    grid = (Bp // TB, Pp // TP)
    kernel = functools.partial(_encoder_kernel, num_patches=P, embed_dim=D)

    const = lambda bi, pi: (0, 0)             # resident parameters (DMA'd once)
    cost = pl.CostEstimate(
        flops=2 * Bp * Pp * Kp * Dp + 2 * Bp * Dp * Fp,
        transcendentals=Bp * Pp,
        bytes_accessed=(x.size * 2 + w1.size * 2 + wp.size * 2
                        + (b1.size + gamma.size + beta.size + bp.size) * 4
                        + Bp * Fp * 4),
    )

    out = pl.pallas_call(
        kernel,
        out_shape=jax.ShapeDtypeStruct((Bp, Fp), jnp.float32),
        grid_spec=pltpu.PrefetchScalarGridSpec(
            num_scalar_prefetch=0,
            grid=grid,
            in_specs=[
                pl.BlockSpec((TB, TP, Kp), lambda bi, pi: (bi, pi, 0)),
                pl.BlockSpec((Kp, Dp), const),
                pl.BlockSpec((1, Dp), const),
                pl.BlockSpec((1, Dp), const),
                pl.BlockSpec((1, Dp), const),
                pl.BlockSpec((Dp, Fp), const),
                pl.BlockSpec((1, Fp), const),
            ],
            out_specs=pl.BlockSpec((TB, Fp), lambda bi, pi: (bi, 0)),
            scratch_shapes=[pltpu.VMEM((TB, Dp), jnp.float32)],
        ),
        compiler_params=pltpu.CompilerParams(
            dimension_semantics=("parallel", "arbitrary"),
            vmem_limit_bytes=24 * 1024 * 1024,
        ),
        cost_estimate=cost,
    )(x, w1, b1, gamma, beta, wp, bp)

    return out[:B, :F]


def _reference_forward(images, params, *, patch=8):
    """Pure-JAX reference with the same bf16-operand / f32-accumulate numerics."""
    B, C, H, W = images.shape
    P = (H // patch) * (W // patch)
    K = C * patch * patch
    x = images.reshape(B, C, H // patch, patch, W // patch, patch)
    x = x.transpose(0, 2, 4, 1, 3, 5).reshape(B * P, K)
    x = x.astype(jnp.bfloat16).astype(jnp.float32)
    w1 = params["w1"].astype(jnp.bfloat16).astype(jnp.float32)
    h = x @ w1 + params["b1"]
    mu = jnp.mean(h, axis=-1, keepdims=True)
    var = jnp.mean((h - mu) ** 2, axis=-1, keepdims=True)
    hn = (h - mu) * jax.lax.rsqrt(var + 1e-5) * params["gamma"] + params["beta"]
    pooled = jnp.mean(hn.reshape(B, P, -1), axis=1)
    wp = params["wp"].astype(jnp.bfloat16).astype(jnp.float32)
    pooled = pooled.astype(jnp.bfloat16).astype(jnp.float32)
    return pooled @ wp + params["bp"]


if __name__ == "__main__":
    # Small, deterministic example shapes.
    B, C, H, W = 2, 4, 16, 16
    PATCH = 8
    EMBED_DIM = 32
    FEAT_DIM = 32

    key = jax.random.PRNGKey(0)
    k_img, k_par = jax.random.split(key)
    images = jax.random.normal(k_img, (B, C, H, W), jnp.float32)  # NCHW
    params = init_params(k_par, C, PATCH, EMBED_DIM, FEAT_DIM)

    feats = model_wrapper_forward(images, params, patch=PATCH)
    feats = jax.block_until_ready(feats)
    assert feats.shape == (B, FEAT_DIM)
    assert bool(jnp.all(jnp.isfinite(feats)))

    ref = _reference_forward(images, params, patch=PATCH)
    assert bool(jnp.allclose(feats, ref, rtol=2e-2, atol=5e-3)), (
        float(jnp.max(jnp.abs(feats - ref))))
    print("KERNEL_OK")
</pallas_src>

<mosaic_0001>
module attributes {stable_mosaic.version = 11 : i64} {
  func.func @_encoder_kernel(%arg0: i32, %arg1: i32, %arg2: memref<8x8x256xbf16, #tpu.memory_space<vmem>>, %arg3: memref<256x128xbf16, #tpu.memory_space<vmem>>, %arg4: memref<1x128xf32, #tpu.memory_space<vmem>>, %arg5: memref<1x128xf32, #tpu.memory_space<vmem>>, %arg6: memref<1x128xf32, #tpu.memory_space<vmem>>, %arg7: memref<128x128xbf16, #tpu.memory_space<vmem>>, %arg8: memref<1x128xf32, #tpu.memory_space<vmem>>, %arg9: memref<8x128xf32, #tpu.memory_space<vmem>>, %arg10: memref<8x128xf32, #tpu.memory_space<vmem>>) attributes {dimension_semantics = [#tpu.dimension_semantics<parallel>, #tpu.dimension_semantics<arbitrary>], iteration_bounds = array<i64: 1, 1>, scalar_prefetch = 0 : i64, scratch_operands = 1 : i64, tpu.core_type = #tpu.core_type<tc>, window_params = [{transform_indices = @transform_0, window_bounds = array<i64: 8, 8, 256>}, {pipeline_mode = #tpu.pipeline_mode<synchronous>, transform_indices = @transform_1, window_bounds = array<i64: 256, 128>}, {pipeline_mode = #tpu.pipeline_mode<synchronous>, transform_indices = @transform_2, window_bounds = array<i64: 1, 128>}, {pipeline_mode = #tpu.pipeline_mode<synchronous>, transform_indices = @transform_3, window_bounds = array<i64: 1, 128>}, {pipeline_mode = #tpu.pipeline_mode<synchronous>, transform_indices = @transform_4, window_bounds = array<i64: 1, 128>}, {pipeline_mode = #tpu.pipeline_mode<synchronous>, transform_indices = @transform_5, window_bounds = array<i64: 128, 128>}, {pipeline_mode = #tpu.pipeline_mode<synchronous>, transform_indices = @transform_6, window_bounds = array<i64: 1, 128>}, {transform_indices = @transform_7, window_bounds = array<i64: 8, 128>}]} {
    %c0_i32 = arith.constant 0 : i32
    %0 = arith.cmpi eq, %arg1, %c0_i32 : i32
    %1 = arith.extui %0 : i1 to i32
    %c0_i32_0 = arith.constant 0 : i32
    %2 = arith.cmpi ne, %1, %c0_i32_0 : i32
    scf.if %2 {
      %cst_23 = arith.constant 0.000000e+00 : f32
      %59 = vector.broadcast %cst_23 : f32 to vector<8x128xf32>
      %c0_24 = arith.constant 0 : index
      %c0_25 = arith.constant 0 : index
      %60 = vector.load %arg10[%c0_24, %c0_25] : memref<8x128xf32, #tpu.memory_space<vmem>>, vector<8x128xf32>
      tpu.vector_store %arg10[%c0_24, %c0_25], %59 {strides = array<i32>} : memref<8x128xf32, #tpu.memory_space<vmem>>, vector<8x128xf32>,
    } else {
    }
    %c0 = arith.constant 0 : index
    %c0_1 = arith.constant 0 : index
    %c0_2 = arith.constant 0 : index
    %3 = vector.load %arg2[%c0, %c0_1, %c0_2] : memref<8x8x256xbf16, #tpu.memory_space<vmem>>, vector<8x8x256xbf16>
    %4 = vector.shape_cast %3 : vector<8x8x256xbf16> to vector<64x256xbf16>
    %c0_3 = arith.constant 0 : index
    %c0_4 = arith.constant 0 : index
    %5 = vector.load %arg3[%c0_3, %c0_4] : memref<256x128xbf16, #tpu.memory_space<vmem>>, vector<256x128xbf16>
    %cst = arith.constant dense<0.000000e+00> : vector<64x128xf32>
    %6 = tpu.matmul %4, %5, %cst {dimension_numbers = #tpu.dot_dimension_numbers<[1], [0], [0], [1], [0, 0, 1, 1], [], []>} : vector<64x256xbf16>, vector<256x128xbf16>, vector<64x128xf32> -> vector<64x128xf32>
    %c0_5 = arith.constant 0 : index
    %c0_6 = arith.constant 0 : index
    %7 = vector.load %arg4[%c0_5, %c0_6] : memref<1x128xf32, #tpu.memory_space<vmem>>, vector<1x128xf32>
    %8 = vector.broadcast %7 : vector<1x128xf32> to vector<64x128xf32>
    %9 = arith.addf %6, %8 : vector<64x128xf32>
    %10 = tpu.iota {dimensions = array<i32: 1>} : vector<1x128xi32>
    %c32_i32 = arith.constant 32 : i32
    %11 = vector.broadcast %c32_i32 : i32 to vector<1x128xi32>
    %12 = arith.cmpi slt, %10, %11 : vector<1x128xi32>
    %13 = arith.extui %12 : vector<1x128xi1> to vector<1x128xi32>
    %14 = arith.sitofp %13 : vector<1x128xi32> to vector<1x128xf32>
    %15 = vector.broadcast %14 : vector<1x128xf32> to vector<64x128xf32>
    %16 = arith.mulf %9, %15 : vector<64x128xf32>
    %cst_7 = arith.constant dense<0.000000e+00> : vector<64xf32>
    %17 = vector.multi_reduction <add>, %16, %cst_7 [1] : vector<64x128xf32> to vector<64xf32>
    %18 = vector.shape_cast %17 : vector<64xf32> to vector<64x1xf32>
    %cst_8 = arith.constant 3.125000e-02 : f32
    %19 = vector.broadcast %cst_8 : f32 to vector<64x1xf32>
    %20 = arith.mulf %18, %19 : vector<64x1xf32>
    %21 = vector.broadcast %20 : vector<64x1xf32> to vector<64x128xf32>
    %22 = arith.subf %9, %21 : vector<64x128xf32>
    %23 = vector.broadcast %14 : vector<1x128xf32> to vector<64x128xf32>
    %24 = arith.mulf %22, %23 : vector<64x128xf32>
    %25 = arith.mulf %24, %24 : vector<64x128xf32>
    %cst_9 = arith.constant dense<0.000000e+00> : vector<64xf32>
    %26 = vector.multi_reduction <add>, %25, %cst_9 [1] : vector<64x128xf32> to vector<64xf32>
    %27 = vector.shape_cast %26 : vector<64xf32> to vector<64x1xf32>
    %cst_10 = arith.constant 3.125000e-02 : f32
    %28 = vector.broadcast %cst_10 : f32 to vector<64x1xf32>
    %29 = arith.mulf %27, %28 : vector<64x1xf32>
    %cst_11 = arith.constant 9.99999974E-6 : f32
    %30 = vector.broadcast %cst_11 : f32 to vector<64x1xf32>
    %31 = arith.addf %29, %30 : vector<64x1xf32>
    %32 = math.rsqrt %31 : vector<64x1xf32>
    %33 = vector.broadcast %32 : vector<64x1xf32> to vector<64x128xf32>
    %34 = arith.mulf %24, %33 : vector<64x128xf32>
    %c0_12 = arith.constant 0 : index
    %c0_13 = arith.constant 0 : index
    %35 = vector.load %arg5[%c0_12, %c0_13] : memref<1x128xf32, #tpu.memory_space<vmem>>, vector<1x128xf32>
    %36 = vector.broadcast %35 : vector<1x128xf32> to vector<64x128xf32>
    %37 = arith.mulf %34, %36 : vector<64x128xf32>
    %c0_14 = arith.constant 0 : index
    %c0_15 = arith.constant 0 : index
    %38 = vector.load %arg6[%c0_14, %c0_15] : memref<1x128xf32, #tpu.memory_space<vmem>>, vector<1x128xf32>
    %39 = vector.broadcast %38 : vector<1x128xf32> to vector<64x128xf32>
    %40 = arith.addf %37, %39 : vector<64x128xf32>
    %c8_i32 = arith.constant 8 : i32
    %41 = arith.muli %arg1, %c8_i32 : i32
    %42 = tpu.iota {dimensions = array<i32: 1>} : vector<1x8x1xi32>
    %43 = vector.broadcast %41 : i32 to vector<1x8x1xi32>
    %44 = arith.addi %43, %42 : vector<1x8x1xi32>
    %c4_i32 = arith.constant 4 : i32
    %45 = vector.broadcast %c4_i32 : i32 to vector<1x8x1xi32>
    %46 = arith.cmpi slt, %44, %45 : vector<1x8x1xi32>
    %47 = arith.extui %46 : vector<1x8x1xi1> to vector<1x8x1xi32>
    %48 = arith.sitofp %47 : vector<1x8x1xi32> to vector<1x8x1xf32>
    %49 = vector.shape_cast %40 : vector<64x128xf32> to vector<8x8x128xf32>
    %50 = vector.broadcast %48 : vector<1x8x1xf32> to vector<8x8x128xf32>
    %51 = arith.mulf %49, %50 : vector<8x8x128xf32>
    %c0_16 = arith.constant 0 : index
    %c0_17 = arith.constant 0 : index
    %52 = vector.load %arg10[%c0_16, %c0_17] : memref<8x128xf32, #tpu.memory_space<vmem>>, vector<8x128xf32>
    %cst_18 = arith.constant dense<0.000000e+00> : vector<8x128xf32>
    %53 = vector.multi_reduction <add>, %51, %cst_18 [1] : vector<8x8x128xf32> to vector<8x128xf32>
    %54 = arith.addf %52, %53 : vector<8x128xf32>
    %c0_19 = arith.constant 0 : index
    %c0_20 = arith.constant 0 : index
    %55 = vector.load %arg10[%c0_19, %c0_20] : memref<8x128xf32, #tpu.memory_space<vmem>>, vector<8x128xf32>
    tpu.vector_store %arg10[%c0_19, %c0_20], %54 {strides = array<i32>} : memref<8x128xf32, #tpu.memory_space<vmem>>, vector<8x128xf32>,
    %c0_i32_21 = arith.constant 0 : i32
    %56 = arith.cmpi eq, %arg1, %c0_i32_21 : i32
    %57 = arith.extui %56 : i1 to i32
    %c0_i32_22 = arith.constant 0 : i32
    %58 = arith.cmpi ne, %57, %c0_i32_22 : i32
    scf.if %58 {
      %c0_23 = arith.constant 0 : index
      %c0_24 = arith.constant 0 : index
      %59 = vector.load %arg10[%c0_23, %c0_24] : memref<8x128xf32, #tpu.memory_space<vmem>>, vector<8x128xf32>
      %cst_25 = arith.constant 2.500000e-01 : f32
      %60 = vector.broadcast %cst_25 : f32 to vector<8x128xf32>
      %61 = arith.mulf %59, %60 : vector<8x128xf32>
      %62 = arith.truncf %61 : vector<8x128xf32> to vector<8x128xbf16>
      %c0_26 = arith.constant 0 : index
      %c0_27 = arith.constant 0 : index
      %63 = vector.load %arg7[%c0_26, %c0_27] : memref<128x128xbf16, #tpu.memory_space<vmem>>, vector<128x128xbf16>
      %cst_28 = arith.constant dense<0.000000e+00> : vector<8x128xf32>
      %64 = tpu.matmul %62, %63, %cst_28 {dimension_numbers = #tpu.dot_dimension_numbers<[1], [0], [0], [1], [0, 0, 1, 1], [], []>} : vector<8x128xbf16>, vector<128x128xbf16>, vector<8x128xf32> -> vector<8x128xf32>
      %c0_29 = arith.constant 0 : index
      %c0_30 = arith.constant 0 : index
      %65 = vector.load %arg8[%c0_29, %c0_30] : memref<1x128xf32, #tpu.memory_space<vmem>>, vector<1x128xf32>
      %66 = vector.broadcast %65 : vector<1x128xf32> to vector<8x128xf32>
      %67 = arith.addf %64, %66 : vector<8x128xf32>
      %c0_31 = arith.constant 0 : index
      %c0_32 = arith.constant 0 : index
      %68 = vector.load %arg9[%c0_31, %c0_32] : memref<8x128xf32, #tpu.memory_space<vmem>>, vector<8x128xf32>
      tpu.vector_store %arg9[%c0_31, %c0_32], %67 {strides = array<i32>} : memref<8x128xf32, #tpu.memory_space<vmem>>, vector<8x128xf32>,
    } else {
    }
    return
  }
  func.func @transform_0(%arg0: i32, %arg1: i32) -> (i32, i32, i32) {
    %c0_i32 = arith.constant 0 : i32
    %c0_i32_0 = arith.constant 0 : i32
    return %arg0, %arg1, %c0_i32 : i32, i32, i32
  }
  func.func @transform_1(%arg0: i32, %arg1: i32) -> (i32, i32) {
    %c0_i32 = arith.constant 0 : i32
    %c0_i32_0 = arith.constant 0 : i32
    %c0_i32_1 = arith.constant 0 : i32
    return %c0_i32, %c0_i32_0 : i32, i32
  }
  func.func @transform_2(%arg0: i32, %arg1: i32) -> (i32, i32) {
    %c0_i32 = arith.constant 0 : i32
    %c0_i32_0 = arith.constant 0 : i32
    %c0_i32_1 = arith.constant 0 : i32
    return %c0_i32, %c0_i32_0 : i32, i32
  }
  func.func @transform_3(%arg0: i32, %arg1: i32) -> (i32, i32) {
    %c0_i32 = arith.constant 0 : i32
    %c0_i32_0 = arith.constant 0 : i32
    %c0_i32_1 = arith.constant 0 : i32
    return %c0_i32, %c0_i32_0 : i32, i32
  }
  func.func @transform_4(%arg0: i32, %arg1: i32) -> (i32, i32) {
    %c0_i32 = arith.constant 0 : i32
    %c0_i32_0 = arith.constant 0 : i32
    %c0_i32_1 = arith.constant 0 : i32
    return %c0_i32, %c0_i32_0 : i32, i32
  }
  func.func @transform_5(%arg0: i32, %arg1: i32) -> (i32, i32) {
    %c0_i32 = arith.constant 0 : i32
    %c0_i32_0 = arith.constant 0 : i32
    %c0_i32_1 = arith.constant 0 : i32
    return %c0_i32, %c0_i32_0 : i32, i32
  }
  func.func @transform_6(%arg0: i32, %arg1: i32) -> (i32, i32) {
    %c0_i32 = arith.constant 0 : i32
    %c0_i32_0 = arith.constant 0 : i32
    %c0_i32_1 = arith.constant 0 : i32
    return %c0_i32, %c0_i32_0 : i32, i32
  }
  func.func @transform_7(%arg0: i32, %arg1: i32) -> (i32, i32) {
    %c0_i32 = arith.constant 0 : i32
    %c0_i32_0 = arith.constant 0 : i32
    return %arg0, %c0_i32 : i32, i32
  }
}

</mosaic_0001>

<bundles_post_ra>
// kernel: tpu_custom_call.1
= control target key start
LH: loop header
LB: loop body
LE: loop exit
PB: predicated region body
PF: predicated region fallthrough
CT: control target
= control target key end

     0   :  { %12 = vsyncpa [#allocation4], 0  ;;  %s1165_s0 = inlined_call_operand.hbm [shape: bf16[8,8,256], index: 0, kind: input, shape index: {}]   ;;  %s1166_s1 = inlined_call_operand.hbm [shape: bf16[256,128], index: 1, kind: input, shape index: {}]   ;;  %s1167_s2 = inlined_call_operand.vmem [shape: f32[1,128], index: 2, kind: input, shape index: {}]   ;;  %s1168_s3 = inlined_call_operand.vmem [shape: f32[1,128], index: 3, kind: input, shape index: {}]   ;;  %s1169_s4 = inlined_call_operand.vmem [shape: f32[1,128], index: 4, kind: input, shape index: {}]   ;;  %s1170_s5 = inlined_call_operand.hbm [shape: bf16[128,128], index: 5, kind: input, shape index: {}]   ;;  %s1171_s6 = inlined_call_operand.vmem [shape: f32[1,128], index: 6, kind: input, shape index: {}]   ;;  %s1172_s7 = inlined_call_operand.hbm [shape: f32[8,128], index: 7, kind: output, shape index: {}]  }
   0x1   :  { %13 = vsyncpa [#allocation7], 0 }
   0x2   :  { %14 = vsyncpa [#allocation5], 0  ;;  %s948_s24 = smov [#allocation6]   ;;  %s854_s28 = scalar_lea.hbm %s1166_s1, 2048 }
   0x3   :  { %s32_s25 = sshll.u32 %s948_s24, 4  ;;  %p855_p0 = scmp.ne.s32.totalorder %s1166_s1, %s854_s28  ;;  %s33_s25 = int_to_ptr.vmem [resolvable:$true] %s32_s25 }
   0x4   :  { %p858_p1 = scmp.lt.u32.totalorder %s854_s28, %s1166_s1 }
   0x6   :  { %p860_p2 = pnand %p858_p1, %p855_p0 }
   0x8   :  { %863 = shalt.err (!%p860_p2)
}
   0x9   :  { %s864_s10 = scalar_lea.vmem %s33_s25, 2048  ;;  %p869_p4 = scmp.lt.s32.totalorder %s33_s25, %s33_s25 }
   0xa   :  { %p865_p3 = scmp.ne.s32.totalorder %s33_s25, %s864_s10  ;;  %p870_p5 = scmp.lt.s32.totalorder %s864_s10, %s864_s10 }
   0xc   :  { %p871_p6 = por %p870_p5, %p869_p4 }
   0xe   :  { %p872_p7 = pnand %p871_p6, %p865_p3 }
  0x10   :  { %875 = shalt.err (!%p872_p7)
}
  0x11   :  { %s949_s11 = smov 64   ;;  %s950_s12 = smov 4  }
  0x12   :  { %38 = dma.hbm_to_vmem [thread:$0]  %s1166_s1, 2048, %s33_s25, [#allocation7], %s949_s11, %s949_s11, %s950_s12  }
  0x13   :  { %s951_s15 = smov [#allocation3]   ;;  %s876_s19 = scalar_lea.hbm %s1165_s0, 1024 }
  0x14   :  { %s20_s16 = sshll.u32 %s951_s15, 4  ;;  %p877_p8 = scmp.ne.s32.totalorder %s1165_s0, %s876_s19  ;;  %s21_s16 = int_to_ptr.vmem [resolvable:$true] %s20_s16 }
  0x15   :  { %p880_p9 = scmp.lt.u32.totalorder %s876_s19, %s1165_s0 }
  0x17   :  { %p882_p10 = pnand %p880_p9, %p877_p8 }
  0x19   :  { %885 = shalt.err (!%p882_p10)
}
  0x1a   :  { %s886_s24 = scalar_lea.vmem %s21_s16, 1024  ;;  %p891_p12 = scmp.lt.s32.totalorder %s21_s16, %s21_s16 }
  0x1b   :  { %p887_p11 = scmp.ne.s32.totalorder %s21_s16, %s886_s24  ;;  %p892_p13 = scmp.lt.s32.totalorder %s886_s24, %s886_s24 }
  0x1d   :  { %p893_p0 = por %p892_p13, %p891_p12 }
  0x1f   :  { %p894_p1 = pnand %p893_p0, %p887_p11 }
  0x21   :  { %897 = shalt.err (!%p894_p1)
}
  0x22   :  { %s952_s1 = smov 128   ;;  %s953_s25 = smov 8  }
  0x23   :  { %26 = dma.hbm_to_vmem [thread:$0]  %s1165_s0, 1024, %s21_s16, [#allocation4], %s952_s1, %s952_s1, %s953_s25  }
  0x24   :  { %s954_s28 = smov [#allocation8]   ;;  %s898_s9 = scalar_lea.hbm %s1170_s5, 1024 }
  0x25   :  { %s50_s29 = sshll.u32 %s954_s28, 4  ;;  %p899_p2 = scmp.ne.s32.totalorder %s1170_s5, %s898_s9  ;;  %s51_s29 = int_to_ptr.vmem [resolvable:$true] %s50_s29 }
  0x26   :  { %p902_p3 = scmp.lt.u32.totalorder %s898_s9, %s1170_s5 }
  0x28   :  { %p904_p4 = pnand %p902_p3, %p899_p2 }
  0x2a   :  { %907 = shalt.err (!%p904_p4)
}
  0x2b   :  { %s908_s17 = scalar_lea.vmem %s51_s29, 1024  ;;  %p913_p6 = scmp.lt.s32.totalorder %s51_s29, %s51_s29 }
  0x2c   :  { %p909_p5 = scmp.ne.s32.totalorder %s51_s29, %s908_s17  ;;  %p914_p7 = scmp.lt.s32.totalorder %s908_s17, %s908_s17 }
  0x2e   :  { %p915_p8 = por %p914_p7, %p913_p6 }
  0x30   :  { %p916_p9 = pnand %p915_p8, %p909_p5 }
  0x32   :  { %919 = shalt.err (!%p916_p9)
}
  0x33   :  { %56 = dma.hbm_to_vmem [thread:$0]  %s1170_s5, 1024, %s51_s29, [#allocation7], %s949_s11, %s949_s11, %s950_s12  }
  0x34   :  { %942 = dma.done.wait [#allocation4], 1024  }
  0x35   :  { %943 = vsyncadd [#allocation4], 4294966272 }
  0x36   :  { %944 = dma.done.wait [#allocation7], 3072  }
  0x37   :  { %945 = vsyncadd [#allocation7], 4294964224  ;;  %v802_v0 = vld [vmem:[#allocation6 + $0x40] sm:$0xff]   ;;  %v804_v2 = vld [vmem:[#allocation6 + $0x48] sm:$0xff]   ;;  %v955_v24 = vmov 0.0   ;;  %v322_v25 = vlaneseq  ;;  %vm956_vm1 = vmmov 0  }
  0x38   :  { %v803_v1 = vld [vmem:[#allocation6] sm:$0xff]   ;;  %723 = vmatprep.subr.bf16.mxu0 %v802_v0  ;;  %v805_v3 = vld [vmem:[#allocation6 + $0x8] sm:$0xff]   ;;  %v806_v4 = vld [vmem:[#allocation6 + $0x50] sm:$0xff]   ;;  %772 = vmatprep.subr.bf16.mxu1 %v955_v24  ;;  %vm534_vm3 = vcmask 1041409   ;;  %vm536_vm4 = vcmask 1042434   ;;  %vm538_vm5 = vcmask 1043459  }
  0x39   :  { %724 = vmatpush3.bf16.msra.mxu0 %v803_v1  ;;  %v807_v5 = vld [vmem:[#allocation6 + $0x10] sm:$0xff]   ;;  %v808_v6 = vld [vmem:[#allocation6 + $0x58] sm:$0xff]   ;;  %v810_v8 = vld [vmem:[#allocation6 + $0x60] sm:$0xff]   ;;  %v323_v26 = vand.u32 127, %v322_v25  ;;  %788 = vmatprep.mubr.msk.bf16.mxu1 %vm956_vm1, %v955_v24  ;;  %vm540_vm6 = vcmask 1044484   ;;  %vm542_vm7 = vcmask 1045509  }
  0x3a   :  { %725 = vmatprep.subr.bf16.mxu0 %v804_v2  ;;  %v809_v7 = vld [vmem:[#allocation6 + $0x18] sm:$0xff]   ;;  %v811_v9 = vld [vmem:[#allocation6 + $0x20] sm:$0xff]   ;;  %v812_v10 = vld [vmem:[#allocation6 + $0x68] sm:$0xff]   ;;  %vm544_vm8 = vcmask 1046534   ;;  %vm546_vm9 = vcmask 1047559   ;;  %s957_s20 = smov [#allocation9]  }
  0x3b   :  { %v820_v11 = vld [vmem:[#allocation3 + $0x4] ss:$8 sps:$4 sm:$0xff]   ;;  %v814_v13 = vld [vmem:[#allocation6 + $0x70] sm:$0xff]   ;;  %v816_v15 = vld [vmem:[#allocation6 + $0x78] sm:$0xff]   ;;  %vm324_vm0 = vcmp.lt.s32.totalorder %v323_v26, 32  ;;  %s675_s21 = sshll.u32 %s957_s20, 4  ;;  %s676_s21 = int_to_ptr.vmem [resolvable:$true] %s675_s21 }
  0x3c   :  { %v813_v12 = vld [vmem:[#allocation6 + $0x28] sm:$0xff]   ;;  %289 = vmatprep.mubr.bf16.mxu0 %v820_v11  ;;  %v815_v14 = vld [vmem:[#allocation6 + $0x30] sm:$0xff]   ;;  %v817_v16 = vld [vmem:[#allocation6 + $0x38] sm:$0xff]   ;;  %v1046_v33 = vsel %vm324_vm0, 1.0, %v955_v24  ;;  %s920_s22 = scalar_lea.vmem %s676_s21, 128  ;;  %p925_p11 = scmp.lt.s32.totalorder %s676_s21, %s676_s21 }
  0x3d   :  { %726 = vmatpush3.bf16.msra.mxu0 %v805_v3  ;;  %v818_v17 = vld [vmem:[#allocation3] ss:$8 sps:$4 sm:$0xff]   ;;  %v821_v18 = vld [vmem:[#allocation3 + $0x14] ss:$8 sps:$4 sm:$0xff]   ;;  %v823_v19 = vld [vmem:[#allocation3 + $0x10] ss:$8 sps:$4 sm:$0xff]   ;;  %p921_p10 = scmp.ne.s32.totalorder %s676_s21, %s920_s22  ;;  %p926_p12 = scmp.lt.s32.totalorder %s920_s22, %s920_s22 }
  0x3e   :  { %727 = vmatprep.subr.bf16.mxu0 %v806_v4  ;;  %v824_v20 = vld [vmem:[#allocation3 + $0x24] ss:$8 sps:$4 sm:$0xff]   ;;  %v826_v21 = vld [vmem:[#allocation3 + $0x20] ss:$8 sps:$4 sm:$0xff]   ;;  %v827_v22 = vld [vmem:[#allocation3 + $0x34] ss:$8 sps:$4 sm:$0xff]  }
  0x3f   :  { %v829_v23 = vld [vmem:[#allocation3 + $0x30] ss:$8 sps:$4 sm:$0xff]   ;;  %v685_v29 = vld [vmem:[%s1167_s2] ss:$0 sm:$0xff]  ;;  %p927_p13 = por %p926_p12, %p925_p11 }
  0x41   :  { %728 = vmatpush3.bf16.msra.mxu0 %v807_v5  ;;  %p928_p0 = pnand %p927_p13, %p921_p10 }
  0x42   :  { %729 = vmatprep.subr.bf16.mxu0 %v808_v6 }
  0x45   :  { %730 = vmatpush3.bf16.msra.mxu0 %v809_v7 }
  0x46   :  { %731 = vmatprep.subr.bf16.mxu0 %v810_v8 }
  0x49   :  { %732 = vmatpush3.bf16.msra.mxu0 %v811_v9 }
  0x4a   :  { %733 = vmatprep.subr.bf16.mxu0 %v812_v10 }
  0x4d   :  { %734 = vmatpush3.bf16.msra.mxu0 %v813_v12 }
  0x4e   :  { %735 = vmatprep.subr.bf16.mxu0 %v814_v13 }
  0x51   :  { %736 = vmatpush3.bf16.msra.mxu0 %v815_v14 }
  0x52   :  { %737 = vmatprep.subr.bf16.mxu0 %v816_v15 }
  0x55   :  { %738 = vmatpush3.bf16.msra.mxu0 %v817_v16 }
  0x58   :  { %290 = vmatmul.mubr.bf16.vlgmr.msra.gmra.mrb[0].mxu0 %v818_v17 }
  0x59   :  { %297 = vmatprep.mubr.bf16.mxu0 %v821_v18 }
  0x60   :  { %298 = vmatmul.mubr.bf16.gmra.mrb[4].mxu0 %v823_v19 }
  0x61   :  { %305 = vmatprep.mubr.bf16.mxu0 %v824_v20 }
  0x68   :  { %306 = vmatmul.mubr.bf16.gmra.mrb[8].mxu0 %v826_v21 }
  0x69   :  { %313 = vmatprep.mubr.bf16.mxu0 %v827_v22 }
  0x70   :  { %314 = vmatmul.mubr.bf16.gmra.mrb[12].mxu0 %v829_v23 }
 0x12b   :  { %v739_v27 = vpop.f32.mrb[0].mxu0 }
 0x12c   :  { %v740_v28 = vpop.f32.mrb[1].mxu0 }
 0x12d   :  { %v741_v30 = vadd.f32 %v740_v28, %v739_v27  ;;  %v742_v31 = vpop.f32.mrb[2].mxu0 }
 0x12e   :  { %v743_v32 = vpop.f32.mrb[3].mxu0 }
 0x12f   :  { %v744_v34 = vadd.f32 %v743_v32, %v742_v31  ;;  %v292_v35 = vadd.f32 %v741_v30, %v685_v29 }
 0x131   :  { %v295_v36 = vadd.f32 %v744_v34, %v685_v29  ;;  %v327_v37 = vmul.f32 %v1046_v33, %v292_v35 }
 0x133   :  { %v745_v38 = vpop.f32.mrb[4].mxu0  ;;  %335 = vadd.xlane.f32.xlu0 %v327_v37  ;;  %v328_v42 = vmul.f32 %v1046_v33, %v295_v36 }
 0x134   :  { %v746_v39 = vpop.f32.mrb[5].mxu0 }
 0x135   :  { %v747_v40 = vadd.f32 %v746_v39, %v745_v38  ;;  %v748_v41 = vpop.f32.mrb[6].mxu0 }
 0x136   :  { %v749_v43 = vpop.f32.mrb[7].mxu0 }
 0x137   :  { %v750_v44 = vadd.f32 %v749_v43, %v748_v41  ;;  %337 = vadd.xlane.f32.xlu0 %v328_v42  ;;  %v300_v45 = vadd.f32 %v747_v40, %v685_v29 }
 0x139   :  { %v303_v46 = vadd.f32 %v750_v44, %v685_v29  ;;  %v329_v47 = vmul.f32 %v1046_v33, %v300_v45 }
 0x13b   :  { %v751_v48 = vpop.f32.mrb[8].mxu0  ;;  %339 = vadd.xlane.f32.xlu1 %v329_v47  ;;  %v330_v52 = vmul.f32 %v1046_v33, %v303_v46 }
 0x13c   :  { %v752_v49 = vpop.f32.mrb[9].mxu0 }
 0x13d   :  { %v753_v50 = vadd.f32 %v752_v49, %v751_v48  ;;  %v754_v51 = vpop.f32.mrb[10].mxu0  ;;  %v830_v48 = vld [vmem:[#allocation8] sm:$0xff]   ;;  %v831_v49 = vld [vmem:[#allocation8 + $0x8] sm:$0xff]  }
 0x13e   :  { %v755_v53 = vpop.f32.mrb[11].mxu0  ;;  %773 = vmatpush3.bf16.msra.mxu1 %v830_v48 }
 0x13f   :  { %v308_v54 = vadd.f32 %v753_v50, %v685_v29  ;;  %v756_v55 = vadd.f32 %v755_v53, %v754_v51  ;;  %341 = vadd.xlane.f32.xlu1 %v330_v52  ;;  %774 = vmatprep.subr.bf16.mxu1 %v955_v24  ;;  %v832_v50 = vld [vmem:[#allocation8 + $0x10] sm:$0xff]   ;;  %v833_v51 = vld [vmem:[#allocation8 + $0x18] sm:$0xff]   ;;  %v835_v52 = vld [vmem:[#allocation8 + $0x28] sm:$0xff]  }
 0x140   :  { %v836_v53 = vld [vmem:[#allocation8 + $0x30] sm:$0xff]  }
 0x141   :  { %v311_v56 = vadd.f32 %v756_v55, %v685_v29  ;;  %v331_v57 = vmul.f32 %v1046_v33, %v308_v54 }
 0x142   :  { %775 = vmatpush3.bf16.msra.mxu1 %v831_v49 }
 0x143   :  { %v757_v58 = vpop.f32.mrb[12].mxu0  ;;  %343 = vadd.xlane.f32.xlu0 %v331_v57  ;;  %v332_v59 = vmul.f32 %v1046_v33, %v311_v56  ;;  %776 = vmatprep.subr.bf16.mxu1 %v955_v24 }
 0x144   :  { %v758_v60 = vpop.f32.mrb[13].mxu0 }
 0x145   :  { %v759_v61 = vadd.f32 %v758_v60, %v757_v58  ;;  %v760_v62 = vpop.f32.mrb[14].mxu0  ;;  %345 = vadd.xlane.f32.xlu1 %v332_v59 }
 0x146   :  { %v761_v63 = vpop.f32.mrb[15].mxu0  ;;  %777 = vmatpush3.bf16.msra.mxu1 %v832_v50 }
 0x147   :  { %v316_v0 = vadd.f32 %v759_v61, %v685_v29  ;;  %v762_v1 = vadd.f32 %v761_v63, %v760_v62  ;;  %778 = vmatprep.subr.bf16.mxu1 %v955_v24 }
 0x149   :  { %v319_v2 = vadd.f32 %v762_v1, %v685_v29  ;;  %v333_v3 = vmul.f32 %v1046_v33, %v316_v0 }
 0x14a   :  { %779 = vmatpush3.bf16.msra.mxu1 %v833_v51 }
 0x14b   :  { %347 = vadd.xlane.f32.xlu0 %v333_v3  ;;  %v334_v4 = vmul.f32 %v1046_v33, %v319_v2  ;;  %780 = vmatprep.subr.bf16.mxu1 %v955_v24 }
 0x14d   :  { %349 = vadd.xlane.f32.xlu1 %v334_v4  ;;  %v1107_v4 = vld [vmem:[%s1168_s3] ss:$0 sm:$0xff] }
 0x1c0   :  { %v336_v5 = vpop.xlane.xlu0 %335 }
 0x1c1   :  { %v351_v6 = vmul.f32 0.03125, %v336_v5 }
 0x1c3   :  { %v359_v7 = vsub.f32 %v292_v35, %v351_v6 }
 0x1c4   :  { %v338_v8 = vpop.xlane.xlu0 %337 }
 0x1c5   :  { %v352_v9 = vmul.f32 0.03125, %v338_v8  ;;  %v1057_v10 = vmul.f32 %v1046_v33, %v359_v7  ;;  %v463_v7 = vshrl.u32 %v322_v25, 7 }
 0x1c7   :  { %v360_v11 = vsub.f32 %v295_v36, %v352_v9  ;;  %v375_v12 = vmul.f32 %v1057_v10, %v1057_v10  ;;  %vm466_vm2 = vcmp.lt.s32.totalorder %v463_v7, 4 }
 0x1c8   :  { %v340_v13 = vpop.xlane.xlu1 %339 }
 0x1c9   :  { %v353_v14 = vmul.f32 0.03125, %v340_v13  ;;  %383 = vadd.xlane.f32.xlu0 %v375_v12  ;;  %v1062_v15 = vmul.f32 %v1046_v33, %v360_v11 }
 0x1cb   :  { %v361_v16 = vsub.f32 %v300_v45, %v353_v14  ;;  %v376_v17 = vmul.f32 %v1062_v15, %v1062_v15 }
 0x1cc   :  { %v342_v18 = vpop.xlane.xlu1 %341 }
 0x1cd   :  { %v354_v19 = vmul.f32 0.03125, %v342_v18  ;;  %385 = vadd.xlane.f32.xlu1 %v376_v17  ;;  %v1067_v20 = vmul.f32 %v1046_v33, %v361_v16  ;;  %v1115_v16 = vld [vmem:[%s1169_s4] ss:$0 sm:$0xff] }
 0x1cf   :  { %v362_v21 = vsub.f32 %v303_v46, %v354_v19  ;;  %v377_v22 = vmul.f32 %v1067_v20, %v1067_v20 }
 0x1d0   :  { %v344_v23 = vpop.xlane.xlu0 %343 }
 0x1d1   :  { %v355_v26 = vmul.f32 0.03125, %v344_v23  ;;  %387 = vadd.xlane.f32.xlu0 %v377_v22  ;;  %v1072_v27 = vmul.f32 %v1046_v33, %v362_v21  ;;  %v1121_v21 = vsel %vm466_vm2, 1.0, %v955_v24 }
 0x1d2   :  { %v346_v28 = vpop.xlane.xlu1 %345 }
 0x1d3   :  { %v363_v29 = vsub.f32 %v308_v54, %v355_v26  ;;  %v356_v30 = vmul.f32 0.03125, %v346_v28  ;;  %v378_v31 = vmul.f32 %v1072_v27, %v1072_v27  ;;  %v837_v54 = vld [vmem:[#allocation8 + $0x38] sm:$0xff]  }
 0x1d5   :  { %v364_v32 = vsub.f32 %v311_v56, %v356_v30  ;;  %389 = vadd.xlane.f32.xlu1 %v378_v31  ;;  %v1077_v34 = vmul.f32 %v1046_v33, %v363_v29 }
 0x1d7   :  { %v379_v35 = vmul.f32 %v1077_v34, %v1077_v34  ;;  %v1082_v36 = vmul.f32 %v1046_v33, %v364_v32 }
 0x1d8   :  { %v348_v37 = vpop.xlane.xlu0 %347 }
 0x1d9   :  { %v357_v38 = vmul.f32 0.03125, %v348_v37  ;;  %391 = vadd.xlane.f32.xlu0 %v379_v35  ;;  %v380_v39 = vmul.f32 %v1082_v36, %v1082_v36 }
 0x1da   :  { %v350_v40 = vpop.xlane.xlu1 %349 }
 0x1db   :  { %v365_v41 = vsub.f32 %v316_v0, %v357_v38  ;;  %v358_v42 = vmul.f32 0.03125, %v350_v40  ;;  %393 = vadd.xlane.f32.xlu1 %v380_v39 }
 0x1dd   :  { %v366_v43 = vsub.f32 %v319_v2, %v358_v42  ;;  %v1087_v44 = vmul.f32 %v1046_v33, %v365_v41 }
 0x1df   :  { %v381_v45 = vmul.f32 %v1087_v44, %v1087_v44  ;;  %v1092_v46 = vmul.f32 %v1046_v33, %v366_v43  ;;  %v834_v33 = vld [vmem:[#allocation8 + $0x20] sm:$0xff]  }
 0x1e0   :  { %781 = vmatpush3.bf16.msra.mxu1 %v834_v33 }
 0x1e1   :  { %395 = vadd.xlane.f32.xlu0 %v381_v45  ;;  %v382_v47 = vmul.f32 %v1092_v46, %v1092_v46  ;;  %782 = vmatprep.subr.bf16.mxu1 %v955_v24 }
 0x1e3   :  { %397 = vadd.xlane.f32.xlu1 %v382_v47 }
 0x1e4   :  { %783 = vmatpush3.bf16.msra.mxu1 %v835_v52 }
 0x1e5   :  { %784 = vmatprep.subr.bf16.mxu1 %v955_v24 }
 0x1e8   :  { %785 = vmatpush3.bf16.msra.mxu1 %v836_v53 }
 0x1e9   :  { %786 = vmatprep.subr.bf16.mxu1 %v955_v24 }
 0x1ec   :  { %787 = vmatpush3.bf16.msra.mxu1 %v837_v54 }
 0x256   :  { %v384_v55 = vpop.xlane.xlu0 %383 }
 0x257   :  { %v399_v56 = vmul.f32 0.03125, %v384_v55 }
 0x259   :  { %v407_v57 = vadd.f32 1e-05, %v399_v56 }
 0x25a   :  { %v386_v58 = vpop.xlane.xlu1 %385 }
 0x25b   :  { %838 = vrsqrt.f32 %v407_v57  ;;  %v400_v59 = vmul.f32 0.03125, %v386_v58 }
 0x25d   :  { %v408_v60 = vadd.f32 1e-05, %v400_v59 }
 0x25e   :  { %v388_v61 = vpop.xlane.xlu0 %387 }
 0x25f   :  { %840 = vrsqrt.f32 %v408_v60  ;;  %v401_v62 = vmul.f32 0.03125, %v388_v61 }
 0x261   :  { %v409_v63 = vadd.f32 1e-05, %v401_v62 }
 0x262   :  { %v390_v0 = vpop.xlane.xlu1 %389 }
 0x263   :  { %842 = vrsqrt.f32 %v409_v63  ;;  %v402_v1 = vmul.f32 0.03125, %v390_v0 }
 0x265   :  { %v839_v2 = vpop.eup %838  ;;  %v410_v3 = vadd.f32 1e-05, %v402_v1 }
 0x266   :  { %v423_v5 = vmul.f32 %v839_v2, %v1057_v10  ;;  %v392_v6 = vpop.xlane.xlu0 %391 }
 0x267   :  { %844 = vrsqrt.f32 %v410_v3  ;;  %v403_v8 = vmul.f32 0.03125, %v392_v6 }
 0x268   :  { %v394_v9 = vpop.xlane.xlu1 %393  ;;  %v438_v12 = vmul.f32 %v1107_v4, %v423_v5 }
 0x269   :  { %v841_v11 = vpop.eup %840  ;;  %v411_v13 = vadd.f32 1e-05, %v403_v8  ;;  %v404_v14 = vmul.f32 0.03125, %v394_v9 }
 0x26a   :  { %v424_v17 = vmul.f32 %v841_v11, %v1062_v15  ;;  %v453_v19 = vadd.f32 %v1115_v16, %v438_v12 }
 0x26b   :  { %846 = vrsqrt.f32 %v411_v13  ;;  %v412_v10 = vadd.f32 1e-05, %v404_v14 }
 0x26c   :  { %v439_v25 = vmul.f32 %v1107_v4, %v424_v17  ;;  %v469_v32 = vmul.f32 %v1121_v21, %v453_v19 }
 0x26d   :  { %v843_v18 = vpop.eup %842  ;;  %848 = vrsqrt.f32 %v412_v10 }
 0x26e   :  { %v454_v22 = vadd.f32 %v1115_v16, %v439_v25  ;;  %v425_v23 = vmul.f32 %v843_v18, %v1067_v20  ;;  %v396_v26 = vpop.xlane.xlu0 %395  ;;  %v478_v43 = vrot.slane %v469_v32, 4 }
 0x26f   :  { %v405_v28 = vmul.f32 0.03125, %v396_v26 }
 0x270   :  { %v470_v15 = vmul.f32 %v1121_v21, %v454_v22  ;;  %v440_v29 = vmul.f32 %v1107_v4, %v425_v23  ;;  %v398_v30 = vpop.xlane.xlu1 %397  ;;  %v479_v52 = vadd.f32 %v478_v43, %v469_v32 }
 0x271   :  { %v845_v31 = vpop.eup %844  ;;  %v413_v35 = vadd.f32 1e-05, %v405_v28  ;;  %v406_v37 = vmul.f32 0.03125, %v398_v30 }
 0x272   :  { %v455_v38 = vadd.f32 %v1115_v16, %v440_v29  ;;  %v426_v24 = vmul.f32 %v845_v31, %v1072_v27  ;;  %v484_v39 = vrot.slane %v470_v15, 4 }
 0x273   :  { %850 = vrsqrt.f32 %v413_v35  ;;  %v414_v40 = vadd.f32 1e-05, %v406_v37 }
 0x274   :  { %v471_v20 = vmul.f32 %v1121_v21, %v455_v38  ;;  %v441_v41 = vmul.f32 %v1107_v4, %v426_v24  ;;  %v485_v49 = vadd.f32 %v484_v39, %v470_v15 }
 0x275   :  { %v847_v42 = vpop.eup %846  ;;  %852 = vrsqrt.f32 %v414_v40 }
 0x276   :  { %v490_v45 = vrot.slane %v471_v20, 4  ;;  %v456_v47 = vadd.f32 %v1115_v16, %v441_v41  ;;  %v427_v50 = vmul.f32 %v847_v42, %v1077_v34  ;;  %v486_v56 = vrot.slane %v485_v49, 2 }
 0x277   :  { %v849_v48 = vpop.eup %848  ;;  %v480_v34 = vrot.slane %v479_v52, 2 }
 0x278   :  { %v491_v51 = vadd.f32 %v490_v45, %v471_v20  ;;  %v472_v27 = vmul.f32 %v1121_v21, %v456_v47  ;;  %v428_v33 = vmul.f32 %v849_v48, %v1082_v36  ;;  %v442_v53 = vmul.f32 %v1107_v4, %v427_v50 }
 0x279   :  { %v487_v2 = vadd.f32 %v486_v56, %v485_v49  ;;  %v481_v8 = vadd.f32 %v480_v34, %v479_v52  ;;  %v714_v56 = vld [vmem:[%s1171_s6] ss:$0 sm:$0xff] }
 0x27a   :  { %v496_v54 = vrot.slane %v472_v27, 4  ;;  %v443_v55 = vmul.f32 %v1107_v4, %v428_v33  ;;  %v457_v57 = vadd.f32 %v1115_v16, %v442_v53  ;;  %v492_v58 = vrot.slane %v491_v51, 2 }
 0x27b   :  { %v488_v17 = vrot.slane %v487_v2, 1  ;;  %v482_v22 = vrot.slane %v481_v8, 1 }
 0x27c   :  { %v497_v59 = vadd.f32 %v496_v54, %v472_v27  ;;  %v458_v60 = vadd.f32 %v1115_v16, %v443_v55  ;;  %v473_v62 = vmul.f32 %v1121_v21, %v457_v57  ;;  %v493_v7 = vadd.f32 %v492_v58, %v491_v51 }
 0x27d   :  { %v851_v61 = vpop.eup %850  ;;  %v489_v29 = vadd.f32 %v488_v17, %v487_v2  ;;  %v483_v37 = vadd.f32 %v482_v22, %v481_v8 }
 0x27e   :  { %v474_v63 = vmul.f32 %v1121_v21, %v458_v60  ;;  %v429_v36 = vmul.f32 %v851_v61, %v1087_v44  ;;  %v498_v0 = vrot.slane %v497_v59, 2  ;;  %v502_v3 = vrot.slane %v473_v62, 4 }
 0x27f   :  { %v853_v1 = vpop.eup %852  ;;  %v494_v19 = vrot.slane %v493_v7, 1  ;;  %v535_v20 = vsel %vm534_vm3, %v489_v29, %v483_v37 }
 0x280   :  { %v444_v5 = vmul.f32 %v1107_v4, %v429_v36  ;;  %v430_v6 = vmul.f32 %v853_v1, %v1092_v46  ;;  %v499_v9 = vadd.f32 %v498_v0, %v497_v59  ;;  %v503_v11 = vadd.f32 %v502_v3, %v473_v62 }
 0x281   :  { %v508_v12 = vrot.slane %v474_v63, 4  ;;  %v495_v32 = vadd.f32 %v494_v19, %v493_v7 }
 0x282   :  { %v459_v13 = vadd.f32 %v1115_v16, %v444_v5  ;;  %v445_v14 = vmul.f32 %v1107_v4, %v430_v6  ;;  %v504_v10 = vrot.slane %v503_v11, 2  ;;  %v500_v23 = vrot.slane %v499_v9, 1 }
 0x283   :  { %v509_v44 = vadd.f32 %v508_v12, %v474_v63  ;;  %v537_v42 = vsel %vm536_vm4, %v495_v32, %v535_v20 }
 0x284   :  { %v460_v25 = vadd.f32 %v1115_v16, %v445_v14  ;;  %v475_v18 = vmul.f32 %v1121_v21, %v459_v13  ;;  %v505_v46 = vadd.f32 %v504_v10, %v503_v11  ;;  %v501_v38 = vadd.f32 %v500_v23, %v499_v9 }
 0x285   :  { %v510_v26 = vrot.slane %v509_v44, 2 }
 0x286   :  { %v476_v28 = vmul.f32 %v1121_v21, %v460_v25  ;;  %v514_v15 = vrot.slane %v475_v18, 4  ;;  %v506_v30 = vrot.slane %v505_v46, 1  ;;  %v539_v45 = vsel %vm538_vm5, %v501_v38, %v537_v42 }
 0x287   :  { %v511_v31 = vadd.f32 %v510_v26, %v509_v44 }
 0x288   :  { %v515_v4 = vadd.f32 %v514_v15, %v475_v18  ;;  %v520_v35 = vrot.slane %v476_v28, 4  ;;  %v507_v24 = vadd.f32 %v506_v30, %v505_v46 }
 0x289   :  { %v512_v16 = vrot.slane %v511_v31, 1 }
 0x28a   :  { %v516_v39 = vrot.slane %v515_v4, 2  ;;  %v521_v40 = vadd.f32 %v520_v35, %v476_v28  ;;  %v541_v49 = vsel %vm540_vm6, %v507_v24, %v539_v45 }
 0x28b   :  { %v513_v43 = vadd.f32 %v512_v16, %v511_v31 }
 0x28c   :  { %v517_v41 = vadd.f32 %v516_v39, %v515_v4  ;;  %v522_v21 = vrot.slane %v521_v40, 2 }
 0x28d   :  { %v543_v27 = vsel %vm542_vm7, %v513_v43, %v541_v49 }
 0x28e   :  { %v518_v47 = vrot.slane %v517_v41, 1  ;;  %v523_v48 = vadd.f32 %v522_v21, %v521_v40 }
 0x290   :  { %v519_v50 = vadd.f32 %v518_v47, %v517_v41  ;;  %v524_v51 = vrot.slane %v523_v48, 1 }
 0x292   :  { %v525_v33 = vadd.f32 %v524_v51, %v523_v48  ;;  %v545_v52 = vsel %vm544_vm8, %v519_v50, %v543_v27 }
 0x294   :  { %v547_v53 = vsel %vm546_vm9, %v525_v33, %v545_v52 }
 0x295   :  { %v555_v54 = vmul.f32 0.25, %v547_v53 }
 0x297   :  { %v556_v55 = vpack.c.bf16 %v555_v54, %v555_v54 }
 0x299   :  { %789 = vmatmul.mubr.bf16.vlgmr.msra.gmra.mrb[0].mxu1 %v556_v55 }
 0x36c   :  { %v662_v57 = vpop.f32.mrb[0].mxu1 }
 0x36d   :  { %v663_v58 = vadd.f32 %v714_v56, %v662_v57  ;;  %v790_v59 = vpop.f32.mrb[1].mxu1 }
 0x36e   :  { %v665_v60 = vpop.f32.mrb[2].mxu1 }
 0x36f   :  { %668 = vst [vmem:[#allocation9] sm:$0xff] %v663_v58  ;;  %v791_v61 = vpop.f32.mrb[3].mxu1 }
 0x370   :  { %931 = shalt.err (!%p928_p0)
}
 0x371   :  { %s932_s6 = scalar_lea.hbm %s1172_s7, 128 }
 0x372   :  { %p933_p1 = scmp.ne.s32.totalorder %s1172_s7, %s932_s6  ;;  %p936_p2 = scmp.lt.u32.totalorder %s932_s6, %s1172_s7 }
 0x374   :  { %p938_p3 = pnand %p936_p2, %p933_p1 }
 0x376   :  { %941 = shalt.err (!%p938_p3)
}
 0x377   :  { %678 = dma.vmem_to_hbm [thread:$0]  %s676_s21, 128, %s1172_s7, [#allocation5]  }
 0x378   :  { %946 = dma.done.wait [#allocation5], 128  }
 0x379   :  { %947 = vsyncadd [#allocation5], 4294967168 }
 0x37a   :  { %682 = vsyncpa [#allocation4], 1 }
 0x37b   :  { %683 = vsyncpa [#allocation7], 1 }
 0x37c   :  { %684 = vsyncpa [#allocation5], 1 }

</bundles_post_ra>
